<compile_context>
chip_gen: v5e
topology: v5e:2x2
jax: 0.10.0
libtpu: 0.0.40
codegen_flags: <defaults>
</compile_context>

<pallas_src>
import jax
import jax.numpy as jnp
from jax.experimental import pallas as pl
from jax.experimental.pallas import tpu as pltpu

NEG_SLOPE = 0.01        # nn.LeakyReLU default negative_slope
BN_EPS = 1e-5           # nn.BatchNorm1d default eps
LANE = 128              # padded feature width (one vreg lane dimension)
HOMOG = LANE - 1        # lane reserved for the constant 1.0 (bias via matmul)
MAX_BATCH_TILE = 512    # batch tile when B is large (parallel grid axis)


# ---------------------------------------------------------------------------
# Fused kernel: whole decoder in one invocation (one batch tile per grid step)
# ---------------------------------------------------------------------------
def _make_fused_decoder_kernel(n_layers):
    """Kernel over refs (x, w_all, out).

    x     : (bt, 128)           activations, lane HOMOG == 1.0, rest of pad == 0
    w_all : (n_layers, 128,128) per-layer padded weights; row HOMOG = bias,
                                [HOMOG, HOMOG] = 1.0 so lane HOMOG stays 1
    out   : (bt, 128)           lane-dense padded output
    """

    def kernel(x_ref, w_ref, o_ref):
        h = x_ref[...].astype(jnp.float32)                       # (bt, 128)
        # Hidden blocks: Linear(+bias via homog lane) -> LeakyReLU.
        # (BatchNorm already folded into the next layer; Dropout = identity.)
        for i in range(n_layers - 1):
            y = jnp.dot(h, w_ref[i], preferred_element_type=jnp.float32)
            h = jnp.maximum(y, NEG_SLOPE * y)                    # LeakyReLU
        # Final Linear -> Tanh (padded lanes -> tanh(0)=0, sliced off outside).
        y = jnp.dot(h, w_ref[n_layers - 1], preferred_element_type=jnp.float32)
        o_ref[...] = jnp.tanh(y).astype(o_ref.dtype)
        # TODO(synk): Dropout modeled in eval mode (identity); training-mode
        # stochastic dropout would use pltpu.prng_seed / prng_random_bits.

    return kernel


# ---------------------------------------------------------------------------
# Build-time preparation + wrapper
# ---------------------------------------------------------------------------
def build_decoder_forward(hidden_params, out_params):
    """Fold BN into next Linear, pack all weights+biases into one padded slab."""
    w_out, b_out = out_params
    n_hidden = len(hidden_params)
    n_layers = n_hidden + 1

    # Pre-transposed weights (Fin, Fout) and biases, all f32.
    ws = [p["w"].T.astype(jnp.float32) for p in hidden_params]
    ws.append(w_out.T.astype(jnp.float32))
    bs = [p["b"].astype(jnp.float32) for p in hidden_params]
    bs.append(b_out.astype(jnp.float32))

    # Fold BatchNorm of hidden layer i into layer i+1 (BN sits after LeakyReLU
    # and before an identity Dropout, so its affine commutes into the next matmul).
    for i, p in enumerate(hidden_params):
        scale = p["gamma"] * jax.lax.rsqrt(p["var"] + BN_EPS)
        shift = p["beta"] - p["mean"] * scale
        bs[i + 1] = bs[i + 1] + shift @ ws[i + 1]      # uses the UNSCALED weight
        ws[i + 1] = scale[:, None] * ws[i + 1]

    # Pack into a single (n_layers, 128, 128) zero-padded slab.
    #   rows 0:Fin, cols 0:Fout -> weight ; row HOMOG cols 0:Fout -> bias ;
    #   [HOMOG, HOMOG] = 1 keeps the homogeneous lane equal to 1 layer-to-layer.
    in_features = ws[0].shape[0]
    out_features = ws[-1].shape[1]
    w_all = jnp.zeros((n_layers, LANE, LANE), jnp.float32)
    for i in range(n_layers):
        fin, fout = ws[i].shape
        assert fin <= HOMOG and fout <= HOMOG, (fin, fout)
        w_all = w_all.at[i, :fin, :fout].set(ws[i])
        w_all = w_all.at[i, HOMOG, :fout].set(bs[i])
        w_all = w_all.at[i, HOMOG, HOMOG].set(1.0)

    kernel = _make_fused_decoder_kernel(n_layers)

    @jax.jit
    def forward(x):
        B = x.shape[0]
        bt = B if B <= MAX_BATCH_TILE else MAX_BATCH_TILE
        grid = (pl.cdiv(B, bt),)

        # Lane-dense, zero-padded input with the homogeneous 1.0 in lane HOMOG.
        x_pad = jnp.zeros((B, LANE), jnp.float32)
        x_pad = x_pad.at[:, :in_features].set(x.astype(jnp.float32))
        x_pad = x_pad.at[:, HOMOG].set(1.0)

        out_pad = pl.pallas_call(
            kernel,
            out_shape=jax.ShapeDtypeStruct((B, LANE), x.dtype),
            grid=grid,
            in_specs=[
                pl.BlockSpec((bt, LANE), lambda i: (i, 0)),               # x tile
                pl.BlockSpec((n_layers, LANE, LANE), lambda i: (0, 0, 0)),  # resident weights
            ],
            out_specs=pl.BlockSpec((bt, LANE), lambda i: (i, 0)),
            compiler_params=pltpu.CompilerParams(
                dimension_semantics=("parallel",)),
        )(x_pad, w_all)
        return out_pad[:, :out_features]

    return forward


# ---------------------------------------------------------------------------
# Parameter construction (deterministic, mirrors the module's __init__ shapes)
# ---------------------------------------------------------------------------
def init_decoder_params(key, in_features, hidden_sizes, out_features=46):
    params = []
    fin = in_features
    for fout in hidden_sizes:
        key, kw, kb, kg, kbe, km, kv = jax.random.split(key, 7)
        bound = 1.0 / jnp.sqrt(fin)
        w = jax.random.uniform(kw, (fout, fin), jnp.float32, -bound, bound)
        b = jax.random.uniform(kb, (fout,), jnp.float32, -bound, bound)
        gamma = 1.0 + 0.1 * jax.random.normal(kg, (fout,), jnp.float32)
        beta = 0.1 * jax.random.normal(kbe, (fout,), jnp.float32)
        r_mean = 0.1 * jax.random.normal(km, (fout,), jnp.float32)
        r_var = 0.5 + jax.random.uniform(kv, (fout,), jnp.float32)  # > 0
        params.append(dict(w=w, b=b, gamma=gamma, beta=beta,
                           mean=r_mean, var=r_var))
        fin = fout
    key, kw, kb = jax.random.split(key, 3)
    bound = 1.0 / jnp.sqrt(fin)
    w_out = jax.random.uniform(kw, (out_features, fin), jnp.float32, -bound, bound)
    b_out = jax.random.uniform(kb, (out_features,), jnp.float32, -bound, bound)
    return params, (w_out, b_out)


# ---------------------------------------------------------------------------
# Pure-JAX reference (eval-mode semantics, matches the PyTorch module)
# ---------------------------------------------------------------------------
def decoder_forward_ref(x, hidden_params, out_params):
    h = x
    for p in hidden_params:
        y = h @ p["w"].T + p["b"]
        y = jnp.where(y >= 0, y, NEG_SLOPE * y)
        y = (y - p["mean"]) / jnp.sqrt(p["var"] + BN_EPS) * p["gamma"] + p["beta"]
        h = y
    w_out, b_out = out_params
    return jnp.tanh(h @ w_out.T + b_out)


# ---------------------------------------------------------------------------
if __name__ == "__main__":
    key = jax.random.PRNGKey(0)
    k_x, k_p = jax.random.split(key)

    B = 8
    in_features_de = 32
    hidden_sizes = [48, 40, 32, 24, 16]   # n_layers_de = 5, each in [5, 50]

    x = jax.random.normal(k_x, (B, in_features_de), jnp.float32)
    hidden_params, out_params = init_decoder_params(
        k_p, in_features_de, hidden_sizes, out_features=46)

    forward = build_decoder_forward(hidden_params, out_params)
    out = jax.block_until_ready(forward(x))

    ref = decoder_forward_ref(x, hidden_params, out_params)
    assert out.shape == (B, 46), out.shape
    assert jnp.allclose(out, ref, atol=1e-4, rtol=1e-4), \
        float(jnp.max(jnp.abs(out - ref)))

    print("KERNEL_OK")
</pallas_src>

<mosaic_0001>
module attributes {stable_mosaic.version = 11 : i64} {
  func.func @kernel(%arg0: i32, %arg1: memref<8x128xf32, #tpu.memory_space<vmem>>, %arg2: memref<6x128x128xf32, #tpu.memory_space<vmem>>, %arg3: memref<8x128xf32, #tpu.memory_space<vmem>>) attributes {dimension_semantics = [#tpu.dimension_semantics<parallel>], iteration_bounds = array<i64: 1>, scalar_prefetch = 0 : i64, scratch_operands = 0 : i64, tpu.core_type = #tpu.core_type<tc>, window_params = [{transform_indices = @transform_0, window_bounds = array<i64: 8, 128>}, {pipeline_mode = #tpu.pipeline_mode<synchronous>, transform_indices = @transform_1, window_bounds = array<i64: 6, 128, 128>}, {transform_indices = @transform_2, window_bounds = array<i64: 8, 128>}]} {
    %c0 = arith.constant 0 : index
    %c0_0 = arith.constant 0 : index
    %0 = vector.load %arg1[%c0, %c0_0] : memref<8x128xf32, #tpu.memory_space<vmem>>, vector<8x128xf32>
    %c0_1 = arith.constant 0 : index
    %c0_2 = arith.constant 0 : index
    %c0_3 = arith.constant 0 : index
    %1 = vector.load %arg2[%c0_1, %c0_2, %c0_3] : memref<6x128x128xf32, #tpu.memory_space<vmem>>, vector<1x128x128xf32>
    %2 = vector.shape_cast %1 : vector<1x128x128xf32> to vector<128x128xf32>
    %cst = arith.constant dense<0.000000e+00> : vector<8x128xf32>
    %3 = tpu.matmul %0, %2, %cst {dimension_numbers = #tpu.dot_dimension_numbers<[1], [0], [0], [1], [0, 0, 1, 1], [], []>} : vector<8x128xf32>, vector<128x128xf32>, vector<8x128xf32> -> vector<8x128xf32>
    %cst_4 = arith.constant 0.00999999977 : f32
    %4 = vector.broadcast %cst_4 : f32 to vector<8x128xf32>
    %5 = arith.mulf %4, %3 : vector<8x128xf32>
    %6 = arith.maximumf %3, %5 : vector<8x128xf32>
    %c1 = arith.constant 1 : index
    %c0_5 = arith.constant 0 : index
    %c0_6 = arith.constant 0 : index
    %7 = vector.load %arg2[%c1, %c0_5, %c0_6] : memref<6x128x128xf32, #tpu.memory_space<vmem>>, vector<1x128x128xf32>
    %8 = vector.shape_cast %7 : vector<1x128x128xf32> to vector<128x128xf32>
    %cst_7 = arith.constant dense<0.000000e+00> : vector<8x128xf32>
    %9 = tpu.matmul %6, %8, %cst_7 {dimension_numbers = #tpu.dot_dimension_numbers<[1], [0], [0], [1], [0, 0, 1, 1], [], []>} : vector<8x128xf32>, vector<128x128xf32>, vector<8x128xf32> -> vector<8x128xf32>
    %cst_8 = arith.constant 0.00999999977 : f32
    %10 = vector.broadcast %cst_8 : f32 to vector<8x128xf32>
    %11 = arith.mulf %10, %9 : vector<8x128xf32>
    %12 = arith.maximumf %9, %11 : vector<8x128xf32>
    %c2 = arith.constant 2 : index
    %c0_9 = arith.constant 0 : index
    %c0_10 = arith.constant 0 : index
    %13 = vector.load %arg2[%c2, %c0_9, %c0_10] : memref<6x128x128xf32, #tpu.memory_space<vmem>>, vector<1x128x128xf32>
    %14 = vector.shape_cast %13 : vector<1x128x128xf32> to vector<128x128xf32>
    %cst_11 = arith.constant dense<0.000000e+00> : vector<8x128xf32>
    %15 = tpu.matmul %12, %14, %cst_11 {dimension_numbers = #tpu.dot_dimension_numbers<[1], [0], [0], [1], [0, 0, 1, 1], [], []>} : vector<8x128xf32>, vector<128x128xf32>, vector<8x128xf32> -> vector<8x128xf32>
    %cst_12 = arith.constant 0.00999999977 : f32
    %16 = vector.broadcast %cst_12 : f32 to vector<8x128xf32>
    %17 = arith.mulf %16, %15 : vector<8x128xf32>
    %18 = arith.maximumf %15, %17 : vector<8x128xf32>
    %c3 = arith.constant 3 : index
    %c0_13 = arith.constant 0 : index
    %c0_14 = arith.constant 0 : index
    %19 = vector.load %arg2[%c3, %c0_13, %c0_14] : memref<6x128x128xf32, #tpu.memory_space<vmem>>, vector<1x128x128xf32>
    %20 = vector.shape_cast %19 : vector<1x128x128xf32> to vector<128x128xf32>
    %cst_15 = arith.constant dense<0.000000e+00> : vector<8x128xf32>
    %21 = tpu.matmul %18, %20, %cst_15 {dimension_numbers = #tpu.dot_dimension_numbers<[1], [0], [0], [1], [0, 0, 1, 1], [], []>} : vector<8x128xf32>, vector<128x128xf32>, vector<8x128xf32> -> vector<8x128xf32>
    %cst_16 = arith.constant 0.00999999977 : f32
    %22 = vector.broadcast %cst_16 : f32 to vector<8x128xf32>
    %23 = arith.mulf %22, %21 : vector<8x128xf32>
    %24 = arith.maximumf %21, %23 : vector<8x128xf32>
    %c4 = arith.constant 4 : index
    %c0_17 = arith.constant 0 : index
    %c0_18 = arith.constant 0 : index
    %25 = vector.load %arg2[%c4, %c0_17, %c0_18] : memref<6x128x128xf32, #tpu.memory_space<vmem>>, vector<1x128x128xf32>
    %26 = vector.shape_cast %25 : vector<1x128x128xf32> to vector<128x128xf32>
    %cst_19 = arith.constant dense<0.000000e+00> : vector<8x128xf32>
    %27 = tpu.matmul %24, %26, %cst_19 {dimension_numbers = #tpu.dot_dimension_numbers<[1], [0], [0], [1], [0, 0, 1, 1], [], []>} : vector<8x128xf32>, vector<128x128xf32>, vector<8x128xf32> -> vector<8x128xf32>
    %cst_20 = arith.constant 0.00999999977 : f32
    %28 = vector.broadcast %cst_20 : f32 to vector<8x128xf32>
    %29 = arith.mulf %28, %27 : vector<8x128xf32>
    %30 = arith.maximumf %27, %29 : vector<8x128xf32>
    %c5 = arith.constant 5 : index
    %c0_21 = arith.constant 0 : index
    %c0_22 = arith.constant 0 : index
    %31 = vector.load %arg2[%c5, %c0_21, %c0_22] : memref<6x128x128xf32, #tpu.memory_space<vmem>>, vector<1x128x128xf32>
    %32 = vector.shape_cast %31 : vector<1x128x128xf32> to vector<128x128xf32>
    %cst_23 = arith.constant dense<0.000000e+00> : vector<8x128xf32>
    %33 = tpu.matmul %30, %32, %cst_23 {dimension_numbers = #tpu.dot_dimension_numbers<[1], [0], [0], [1], [0, 0, 1, 1], [], []>} : vector<8x128xf32>, vector<128x128xf32>, vector<8x128xf32> -> vector<8x128xf32>
    %34 = math.tanh %33 : vector<8x128xf32>
    %c0_24 = arith.constant 0 : index
    %c0_25 = arith.constant 0 : index
    %35 = vector.load %arg3[%c0_24, %c0_25] : memref<8x128xf32, #tpu.memory_space<vmem>>, vector<8x128xf32>
    tpu.vector_store %arg3[%c0_24, %c0_25], %34 {strides = array<i32>} : memref<8x128xf32, #tpu.memory_space<vmem>>, vector<8x128xf32>,
    return
  }
  func.func @transform_0(%arg0: i32) -> (i32, i32) {
    %c0_i32 = arith.constant 0 : i32
    %c0_i32_0 = arith.constant 0 : i32
    return %arg0, %c0_i32 : i32, i32
  }
  func.func @transform_1(%arg0: i32) -> (i32, i32, i32) {
    %c0_i32 = arith.constant 0 : i32
    %c0_i32_0 = arith.constant 0 : i32
    %c0_i32_1 = arith.constant 0 : i32
    %c0_i32_2 = arith.constant 0 : i32
    return %c0_i32, %c0_i32_0, %c0_i32_1 : i32, i32, i32
  }
  func.func @transform_2(%arg0: i32) -> (i32, i32) {
    %c0_i32 = arith.constant 0 : i32
    %c0_i32_0 = arith.constant 0 : i32
    return %arg0, %c0_i32 : i32, i32
  }
}

</mosaic_0001>

<bundles_post_ra>
// kernel: forward.1
= control target key start
LH: loop header
LB: loop body
LE: loop exit
PB: predicated region body
PF: predicated region fallthrough
CT: control target
= control target key end

     0   :  { %7 = vsyncpa [#allocation3], 0  ;;  %s365_s0 = inlined_call_operand.vmem [shape: f32[8,128], index: 0, kind: input, shape index: {}]   ;;  %s366_s1 = inlined_call_operand.hbm [shape: f32[6,128,128], index: 1, kind: input, shape index: {}]   ;;  %s367_s2 = inlined_call_operand.hbm [shape: f32[8,128], index: 2, kind: output, shape index: {}]  }
   0x1   :  { %8 = vsyncpa [#allocation4], 0  ;;  %s15_s11 = sshll.u32 %s366_s1, 4  ;;  %s337_s12 = smov [#allocation2]   ;;  %s16_s11 = int_to_ptr.hbm [resolvable:$true] %s15_s11 }
   0x2   :  { %s17_s13 = sshll.u32 %s337_s12, 4  ;;  %s338_s14 = smov 128   ;;  %s18_s13 = int_to_ptr.vmem [resolvable:$true] %s17_s13 }
   0x3   :  { %s339_s15 = smov 8  }
   0x4   :  { %23 = dma.hbm_to_vmem [thread:$0]  %s16_s11, 12288, %s18_s13, [#allocation3], %s338_s14, %s338_s14, %s339_s15  }
   0x5   :  { %333 = dma.done.wait [#allocation3], 12288  }
   0x6   :  { %334 = vsyncadd [#allocation3], 4294955008  ;;  %v44_v0 = vld [vmem:[#allocation2 + $0x78] sm:$0xff]  ;;  %v43_v1 = vld [vmem:[#allocation2 + $0x70] sm:$0xff]  ;;  %s269_s20 = sshll.u32 %s367_s2, 4  ;;  %s270_s20 = int_to_ptr.hbm [resolvable:$true] %s269_s20 }
   0x7   :  { %45 = vmatpush.msra.mxu0 %v44_v0  ;;  %v42_v2 = vld [vmem:[#allocation2 + $0x68] sm:$0xff]  ;;  %v41_v3 = vld [vmem:[#allocation2 + $0x60] sm:$0xff]  ;;  %v83_v4 = vld [vmem:[#allocation2 + $0xf8] sm:$0xff] }
   0x8   :  { %v40_v5 = vld [vmem:[#allocation2 + $0x58] sm:$0xff]  ;;  %84 = vmatpush.msra.mxu1 %v83_v4  ;;  %v82_v6 = vld [vmem:[#allocation2 + $0xf0] sm:$0xff]  ;;  %v81_v7 = vld [vmem:[#allocation2 + $0xe8] sm:$0xff] }
   0x9   :  { %46 = vmatpush.msra.mxu0 %v43_v1  ;;  %v39_v8 = vld [vmem:[#allocation2 + $0x50] sm:$0xff]  ;;  %v80_v9 = vld [vmem:[#allocation2 + $0xe0] sm:$0xff]  ;;  %v38_v10 = vld [vmem:[#allocation2 + $0x48] sm:$0xff] }
   0xa   :  { %85 = vmatpush.msra.mxu1 %v82_v6  ;;  %v79_v11 = vld [vmem:[#allocation2 + $0xd8] sm:$0xff]  ;;  %v37_v12 = vld [vmem:[#allocation2 + $0x40] sm:$0xff]  ;;  %v78_v13 = vld [vmem:[#allocation2 + $0xd0] sm:$0xff] }
   0xb   :  { %47 = vmatpush.msra.mxu0 %v42_v2  ;;  %v36_v14 = vld [vmem:[#allocation2 + $0x38] sm:$0xff]  ;;  %v77_v15 = vld [vmem:[#allocation2 + $0xc8] sm:$0xff]  ;;  %v35_v16 = vld [vmem:[#allocation2 + $0x30] sm:$0xff] }
   0xc   :  { %86 = vmatpush.msra.mxu1 %v81_v7  ;;  %v76_v17 = vld [vmem:[#allocation2 + $0xc0] sm:$0xff]  ;;  %v34_v18 = vld [vmem:[#allocation2 + $0x28] sm:$0xff]  ;;  %v75_v19 = vld [vmem:[#allocation2 + $0xb8] sm:$0xff] }
   0xd   :  { %48 = vmatpush.msra.mxu0 %v41_v3  ;;  %v33_v20 = vld [vmem:[#allocation2 + $0x20] sm:$0xff]  ;;  %v74_v21 = vld [vmem:[#allocation2 + $0xb0] sm:$0xff]  ;;  %v32_v22 = vld [vmem:[#allocation2 + $0x18] sm:$0xff] }
   0xe   :  { %87 = vmatpush.msra.mxu1 %v80_v9  ;;  %v73_v23 = vld [vmem:[#allocation2 + $0xa8] sm:$0xff]  ;;  %v31_v24 = vld [vmem:[#allocation2 + $0x10] sm:$0xff]  ;;  %v72_v25 = vld [vmem:[#allocation2 + $0xa0] sm:$0xff] }
   0xf   :  { %49 = vmatpush.msra.mxu0 %v40_v5  ;;  %v30_v26 = vld [vmem:[#allocation2 + $0x8] sm:$0xff]  ;;  %v71_v27 = vld [vmem:[#allocation2 + $0x98] sm:$0xff]  ;;  %v29_v28 = vld [vmem:[#allocation2] sm:$0xff] }
  0x10   :  { %88 = vmatpush.msra.mxu1 %v79_v11  ;;  %v28_v29 = vld [vmem:[%s365_s0] sm:$0xff]  ;;  %v70_v30 = vld [vmem:[#allocation2 + $0x90] sm:$0xff]  ;;  %v69_v31 = vld [vmem:[#allocation2 + $0x88] sm:$0xff]  ;;  %s340_s0 = smov [#allocation5]  }
  0x11   :  { %50 = vmatpush.msra.mxu0 %v39_v8  ;;  %v68_v32 = vld [vmem:[#allocation2 + $0x80] sm:$0xff]  ;;  %v122_v33 = vld [vmem:[#allocation2 + $0x178] sm:$0xff]  ;;  %v121_v34 = vld [vmem:[#allocation2 + $0x170] sm:$0xff]  ;;  %s267_s17 = sshll.u32 %s340_s0, 4  ;;  %s268_s17 = int_to_ptr.vmem [resolvable:$true] %s267_s17 }
  0x12   :  { %89 = vmatpush.msra.mxu1 %v78_v13  ;;  %123 = vmatpush.msra.mxu2 %v122_v33  ;;  %v120_v35 = vld [vmem:[#allocation2 + $0x168] sm:$0xff]  ;;  %v119_v36 = vld [vmem:[#allocation2 + $0x160] sm:$0xff]  ;;  %v118_v37 = vld [vmem:[#allocation2 + $0x158] sm:$0xff] }
  0x13   :  { %51 = vmatpush.msra.mxu0 %v38_v10  ;;  %v117_v38 = vld [vmem:[#allocation2 + $0x150] sm:$0xff]  ;;  %v116_v39 = vld [vmem:[#allocation2 + $0x148] sm:$0xff]  ;;  %v115_v40 = vld [vmem:[#allocation2 + $0x140] sm:$0xff] }
  0x14   :  { %90 = vmatpush.msra.mxu1 %v77_v15  ;;  %124 = vmatpush.msra.mxu2 %v121_v34  ;;  %v114_v41 = vld [vmem:[#allocation2 + $0x138] sm:$0xff]  ;;  %v113_v42 = vld [vmem:[#allocation2 + $0x130] sm:$0xff]  ;;  %v112_v43 = vld [vmem:[#allocation2 + $0x128] sm:$0xff] }
  0x15   :  { %52 = vmatpush.msra.mxu0 %v37_v12  ;;  %v111_v44 = vld [vmem:[#allocation2 + $0x120] sm:$0xff]  ;;  %v110_v45 = vld [vmem:[#allocation2 + $0x118] sm:$0xff]  ;;  %v109_v49 = vld [vmem:[#allocation2 + $0x110] sm:$0xff] }
  0x16   :  { %91 = vmatpush.msra.mxu1 %v76_v17  ;;  %125 = vmatpush.msra.mxu2 %v120_v35  ;;  %v108_v50 = vld [vmem:[#allocation2 + $0x108] sm:$0xff]  ;;  %v107_v51 = vld [vmem:[#allocation2 + $0x100] sm:$0xff]  ;;  %v161_v52 = vld [vmem:[#allocation2 + $0x1f8] sm:$0xff] }
  0x17   :  { %53 = vmatpush.msra.mxu0 %v36_v14  ;;  %v160_v53 = vld [vmem:[#allocation2 + $0x1f0] sm:$0xff]  ;;  %162 = vmatpush.msra.mxu3 %v161_v52  ;;  %v159_v54 = vld [vmem:[#allocation2 + $0x1e8] sm:$0xff]  ;;  %v158_v55 = vld [vmem:[#allocation2 + $0x1e0] sm:$0xff] }
  0x18   :  { %92 = vmatpush.msra.mxu1 %v75_v19  ;;  %126 = vmatpush.msra.mxu2 %v119_v36  ;;  %v157_v56 = vld [vmem:[#allocation2 + $0x1d8] sm:$0xff]  ;;  %v156_v57 = vld [vmem:[#allocation2 + $0x1d0] sm:$0xff]  ;;  %v155_v58 = vld [vmem:[#allocation2 + $0x1c8] sm:$0xff] }
  0x19   :  { %54 = vmatpush.msra.mxu0 %v35_v16  ;;  %163 = vmatpush.msra.mxu3 %v160_v53  ;;  %v154_v59 = vld [vmem:[#allocation2 + $0x1c0] sm:$0xff]  ;;  %v153_v60 = vld [vmem:[#allocation2 + $0x1b8] sm:$0xff]  ;;  %v152_v61 = vld [vmem:[#allocation2 + $0x1b0] sm:$0xff] }
  0x1a   :  { %93 = vmatpush.msra.mxu1 %v74_v21  ;;  %127 = vmatpush.msra.mxu2 %v118_v37  ;;  %v151_v62 = vld [vmem:[#allocation2 + $0x1a8] sm:$0xff]  ;;  %v150_v63 = vld [vmem:[#allocation2 + $0x1a0] sm:$0xff]  ;;  %v149_v0 = vld [vmem:[#allocation2 + $0x198] sm:$0xff] }
  0x1b   :  { %55 = vmatpush.msra.mxu0 %v34_v18  ;;  %164 = vmatpush.msra.mxu3 %v159_v54  ;;  %v148_v4 = vld [vmem:[#allocation2 + $0x190] sm:$0xff]  ;;  %v147_v5 = vld [vmem:[#allocation2 + $0x188] sm:$0xff]  ;;  %v146_v6 = vld [vmem:[#allocation2 + $0x180] sm:$0xff] }
  0x1c   :  { %94 = vmatpush.msra.mxu1 %v73_v23  ;;  %128 = vmatpush.msra.mxu2 %v117_v38  ;;  %v200_v7 = vld [vmem:[#allocation2 + $0x278] sm:$0xff]  ;;  %v199_v8 = vld [vmem:[#allocation2 + $0x270] sm:$0xff]  ;;  %v198_v9 = vld [vmem:[#allocation2 + $0x268] sm:$0xff] }
  0x1d   :  { %56 = vmatpush.msra.mxu0 %v33_v20  ;;  %165 = vmatpush.msra.mxu3 %v158_v55  ;;  %v197_v10 = vld [vmem:[#allocation2 + $0x260] sm:$0xff]  ;;  %v196_v11 = vld [vmem:[#allocation2 + $0x258] sm:$0xff]  ;;  %v195_v12 = vld [vmem:[#allocation2 + $0x250] sm:$0xff] }
  0x1e   :  { %95 = vmatpush.msra.mxu1 %v72_v25  ;;  %129 = vmatpush.msra.mxu2 %v116_v39  ;;  %v194_v13 = vld [vmem:[#allocation2 + $0x248] sm:$0xff]  ;;  %v193_v14 = vld [vmem:[#allocation2 + $0x240] sm:$0xff]  ;;  %v192_v15 = vld [vmem:[#allocation2 + $0x238] sm:$0xff] }
  0x1f   :  { %57 = vmatpush.msra.mxu0 %v32_v22  ;;  %166 = vmatpush.msra.mxu3 %v157_v56  ;;  %v191_v16 = vld [vmem:[#allocation2 + $0x230] sm:$0xff]  ;;  %v190_v17 = vld [vmem:[#allocation2 + $0x228] sm:$0xff]  ;;  %v189_v18 = vld [vmem:[#allocation2 + $0x220] sm:$0xff] }
  0x20   :  { %96 = vmatpush.msra.mxu1 %v71_v27  ;;  %130 = vmatpush.msra.mxu2 %v115_v40  ;;  %v188_v19 = vld [vmem:[#allocation2 + $0x218] sm:$0xff]  ;;  %v187_v23 = vld [vmem:[#allocation2 + $0x210] sm:$0xff]  ;;  %v185_v25 = vld [vmem:[#allocation2 + $0x200] sm:$0xff] }
  0x21   :  { %58 = vmatpush.msra.mxu0 %v31_v24  ;;  %167 = vmatpush.msra.mxu3 %v156_v57  ;;  %v186_v24 = vld [vmem:[#allocation2 + $0x208] sm:$0xff]  ;;  %v238_v27 = vld [vmem:[#allocation2 + $0x2f0] sm:$0xff]  ;;  %v232_v33 = vld [vmem:[#allocation2 + $0x2c0] sm:$0xff] }
  0x22   :  { %97 = vmatpush.msra.mxu1 %v70_v30  ;;  %131 = vmatpush.msra.mxu2 %v114_v41  ;;  %v235_v30 = vld [vmem:[#allocation2 + $0x2d8] sm:$0xff]  ;;  %v230_v35 = vld [vmem:[#allocation2 + $0x2b0] sm:$0xff]  ;;  %v229_v36 = vld [vmem:[#allocation2 + $0x2a8] sm:$0xff] }
  0x23   :  { %59 = vmatpush.msra.mxu0 %v30_v26  ;;  %168 = vmatpush.msra.mxu3 %v155_v58  ;;  %v239_v26 = vld [vmem:[#allocation2 + $0x2f8] sm:$0xff]  ;;  %v228_v37 = vld [vmem:[#allocation2 + $0x2a0] sm:$0xff] }
  0x24   :  { %98 = vmatpush.msra.mxu1 %v69_v31  ;;  %132 = vmatpush.msra.mxu2 %v113_v42  ;;  %v234_v31 = vld [vmem:[#allocation2 + $0x2d0] sm:$0xff]  ;;  %v231_v34 = vld [vmem:[#allocation2 + $0x2b8] sm:$0xff] }
  0x25   :  { %60 = vmatpush.msra.mxu0 %v29_v28  ;;  %169 = vmatpush.msra.mxu3 %v154_v59  ;;  %v237_v28 = vld [vmem:[#allocation2 + $0x2e8] sm:$0xff]  ;;  %v227_v38 = vld [vmem:[#allocation2 + $0x298] sm:$0xff]  ;;  %v226_v42 = vld [vmem:[#allocation2 + $0x290] sm:$0xff] }
  0x26   :  { %61 = vmatmul.f32.vlgmr.msra.gmra.mxu0 %v28_v29  ;;  %99 = vmatpush.msra.mxu1 %v68_v32  ;;  %v236_v29 = vld [vmem:[#allocation2 + $0x2e0] sm:$0xff]  ;;  %v233_v32 = vld [vmem:[#allocation2 + $0x2c8] sm:$0xff] }
  0x27   :  { %133 = vmatpush.msra.mxu2 %v112_v43  ;;  %170 = vmatpush.msra.mxu3 %v153_v60  ;;  %v225_v43 = vld [vmem:[#allocation2 + $0x288] sm:$0xff] }
  0x28   :  { %201 = vmatpush.msrb.mxu0 %v200_v7  ;;  %240 = vmatpush.msrb.mxu1 %v239_v26 }
  0x29   :  { %134 = vmatpush.msra.mxu2 %v111_v44  ;;  %171 = vmatpush.msra.mxu3 %v152_v61  ;;  %v224_v44 = vld [vmem:[#allocation2 + $0x280] sm:$0xff] }
  0x2a   :  { %202 = vmatpush.msrb.mxu0 %v199_v8  ;;  %241 = vmatpush.msrb.mxu1 %v238_v27 }
  0x2b   :  { %135 = vmatpush.msra.mxu2 %v110_v45  ;;  %172 = vmatpush.msra.mxu3 %v151_v62 }
  0x2c   :  { %203 = vmatpush.msrb.mxu0 %v198_v9  ;;  %242 = vmatpush.msrb.mxu1 %v237_v28 }
  0x2d   :  { %136 = vmatpush.msra.mxu2 %v109_v49  ;;  %173 = vmatpush.msra.mxu3 %v150_v63 }
  0x2e   :  { %204 = vmatpush.msrb.mxu0 %v197_v10  ;;  %243 = vmatpush.msrb.mxu1 %v236_v29 }
  0x2f   :  { %137 = vmatpush.msra.mxu2 %v108_v50  ;;  %174 = vmatpush.msra.mxu3 %v149_v0 }
  0x30   :  { %205 = vmatpush.msrb.mxu0 %v196_v11  ;;  %244 = vmatpush.msrb.mxu1 %v235_v30 }
  0x31   :  { %138 = vmatpush.msra.mxu2 %v107_v51  ;;  %175 = vmatpush.msra.mxu3 %v148_v4 }
  0x32   :  { %206 = vmatpush.msrb.mxu0 %v195_v12  ;;  %245 = vmatpush.msrb.mxu1 %v234_v31 }
  0x33   :  { %176 = vmatpush.msra.mxu3 %v147_v5 }
  0x34   :  { %207 = vmatpush.msrb.mxu0 %v194_v13  ;;  %246 = vmatpush.msrb.mxu1 %v233_v32 }
  0x35   :  { %177 = vmatpush.msra.mxu3 %v146_v6 }
  0x36   :  { %208 = vmatpush.msrb.mxu0 %v193_v14  ;;  %247 = vmatpush.msrb.mxu1 %v232_v33 }
  0x38   :  { %209 = vmatpush.msrb.mxu0 %v192_v15  ;;  %248 = vmatpush.msrb.mxu1 %v231_v34 }
  0x3a   :  { %210 = vmatpush.msrb.mxu0 %v191_v16  ;;  %249 = vmatpush.msrb.mxu1 %v230_v35 }
  0x3c   :  { %211 = vmatpush.msrb.mxu0 %v190_v17  ;;  %250 = vmatpush.msrb.mxu1 %v229_v36 }
  0x3e   :  { %212 = vmatpush.msrb.mxu0 %v189_v18  ;;  %251 = vmatpush.msrb.mxu1 %v228_v37 }
  0x40   :  { %213 = vmatpush.msrb.mxu0 %v188_v19  ;;  %252 = vmatpush.msrb.mxu1 %v227_v38 }
  0x42   :  { %214 = vmatpush.msrb.mxu0 %v187_v23  ;;  %253 = vmatpush.msrb.mxu1 %v226_v42 }
  0x44   :  { %215 = vmatpush.msrb.mxu0 %v186_v24  ;;  %254 = vmatpush.msrb.mxu1 %v225_v43 }
  0x46   :  { %216 = vmatpush.msrb.mxu0 %v185_v25  ;;  %255 = vmatpush.msrb.mxu1 %v224_v44 }
  0xa3   :  { %v62_v46 = vpop.f32.mrf.mxu0 }
  0xa4   :  { %v65_v47 = vmul.f32 0.01, %v62_v46 }
  0xa6   :  { %v66_v48 = vmax.f32 %v62_v46, %v65_v47 }
  0xa8   :  { %100 = vmatmul.f32.vlgmr.msra.gmra.mxu1 %v66_v48 }
 0x125   :  { %v101_v1 = vpop.f32.mrf.mxu1 }
 0x126   :  { %v104_v2 = vmul.f32 0.01, %v101_v1 }
 0x128   :  { %v105_v3 = vmax.f32 %v101_v1, %v104_v2 }
 0x12a   :  { %139 = vmatmul.f32.vlgmr.msra.gmra.mxu2 %v105_v3 }
 0x1ad   :  { %v140_v20 = vpop.f32.mrf.mxu2 }
 0x1ae   :  { %v143_v21 = vmul.f32 0.01, %v140_v20 }
 0x1b0   :  { %v144_v22 = vmax.f32 %v140_v20, %v143_v21 }
 0x1b2   :  { %178 = vmatmul.f32.vlgmr.msra.gmra.mxu3 %v144_v22 }
 0x235   :  { %v179_v39 = vpop.f32.mrf.mxu3 }
 0x236   :  { %v182_v40 = vmul.f32 0.01, %v179_v39 }
 0x238   :  { %v183_v41 = vmax.f32 %v179_v39, %v182_v40 }
 0x23a   :  { %217 = vmatmul.f32.vlgmr.msrb.gmra.mxu0 %v183_v41 }
 0x2b7   :  { %v218_v45 = vpop.f32.mrf.mxu0 }
 0x2b8   :  { %v221_v46 = vmul.f32 0.01, %v218_v45 }
 0x2ba   :  { %v222_v47 = vmax.f32 %v218_v45, %v221_v46 }
 0x2bc   :  { %256 = vmatmul.f32.vlgmr.msrb.gmra.mxu1 %v222_v47 }
 0x339   :  { %v257_v48 = vpop.f32.mrf.mxu1 }
 0x33a   :  { %283 = vtanh.f32 %v257_v48 }
 0x340   :  { %v284_v49 = vpop.eup %283 }
 0x341   :  { %261 = vst [vmem:[#allocation5] sm:$0xff] %v284_v49 }
 0x342   :  { %272 = dma.vmem_to_hbm [thread:$0]  %s268_s17, 128, %s270_s20, [#allocation4]  }
 0x343   :  { %335 = dma.done.wait [#allocation4], 128  }
 0x344   :  { %336 = vsyncadd [#allocation4], 4294967168 }
 0x345   :  { %277 = vsyncpa [#allocation3], 1 }
 0x346   :  { %278 = vsyncpa [#allocation4], 1 }

</bundles_post_ra>
